<compile_context>
chip_gen: v7x
topology: tpu7x:2x2x1
jax: 0.10.0
libtpu: 0.0.40
codegen_flags: <defaults>
</compile_context>

<pallas_src>
import functools

import jax
import jax.numpy as jnp
import numpy as np
from jax.experimental import pallas as pl
from jax.experimental.pallas import tpu as pltpu

_EPS = 1e-6  # F.pairwise_distance default eps (added elementwise to the difference)


def _round_up(x, m):
    return (x + m - 1) // m * m


def _contrastive_tri_kernel(bi_ref, bj_ref,
                            e_row_ref, e_col_ref,
                            rterm_ref, cterm_ref,
                            lab_row_ref, lab_col_ref,
                            out_ref,
                            *, margin, batch, tile):
    s = pl.program_id(0)
    bi = bi_ref[s]                      # row block index (SMEM scalar)
    bj = bj_ref[s]                      # col block index

    er = e_row_ref[...]                 # (tile, Dp), native dtype (bf16 stays bf16)
    ec = e_col_ref[...]                 # (tile, Dp)

    # Gram block on the MXU with f32 accumulation (the only matmul per step).
    dn = (((1,), (1,)), ((), ()))       # contract the feature (lane) axis
    g = jax.lax.dot_general(er, ec, dn, preferred_element_type=jnp.float32)  # (tile, tile)

    # ||e_i - e_j + eps||^2 via precomputed row/col terms (eps correction already folded
    # into rterm/cterm in the wrapper):  d2 = rterm_i + cterm_j - 2*G_ij.
    d2 = rterm_ref[...] + cterm_ref[...] - 2.0 * g
    d2 = jnp.maximum(d2, 0.0)           # guard tiny negatives from cancellation

    # Pair masks: all (i < j) pairs inside the un-padded batch; same label -> positive.
    row_idx = bi * tile + jax.lax.broadcasted_iota(jnp.int32, (tile, 1), 0)
    col_idx = bj * tile + jax.lax.broadcasted_iota(jnp.int32, (1, tile), 1)
    valid = (col_idx > row_idx) & (row_idx < batch) & (col_idx < batch)
    same = lab_row_ref[...] == lab_col_ref[...]          # (tile,1) vs (1,tile) -> (tile,tile)

    # Positive: d2 ; negative: relu(margin - dist)^2.  Single fused masked select.
    dist = jnp.sqrt(d2)                                  # EUP
    hinge = jnp.maximum(jnp.float32(margin) - dist, 0.0)
    contrib = jnp.where(valid, jnp.where(same, d2, hinge * hinge), 0.0)

    # One sublane-group reduction to a lane-dense (8, tile) partial; final sum in wrapper.
    out_ref[...] = jnp.sum(contrib.reshape(tile // 8, 8, tile), axis=0)


def contrastive_loss_pallas(embeddings, labels, margin, *, block=256, eps=_EPS):
    """embeddings: [B, D] float (bf16 stays bf16 on the DMA/MXU path),
       labels: [B] ints, margin: python float.  Returns scalar f32 loss."""
    B, D = embeddings.shape
    itemsize = jnp.dtype(embeddings.dtype).itemsize
    Dp = _round_up(D, 128)                                # lane-dense feature axis

    # 256 fills the v6e/v7x 256x256 MXU; shrink for tiny batches or when the
    # double-buffered full-D panels would crowd v7x's 64 MiB VMEM.
    tile = min(int(block), max(128, _round_up(B, 128)))
    while tile > 128 and (4 * tile * Dp * itemsize + 12 * tile * tile * 4) > 40 * 1024 * 1024:
        tile //= 2
    # TODO(synk): for very large D (f32 Dp >~ 16k) add a K/feature grid axis with a VMEM
    # f32 Gram accumulator instead of holding full-D panels.

    Bp = _round_up(B, tile)
    T = Bp // tile

    # Upper-triangular block pairs only (strictly-lower blocks are pure wasted DMA+MXU).
    iu, ju = np.triu_indices(T, k=0)
    nsteps = int(iu.shape[0])
    bi_tab = jnp.asarray(iu.astype(np.int32))
    bj_tab = jnp.asarray(ju.astype(np.int32))

    # Pad only when actually misaligned (avoid rewriting an aligned table in HBM).
    e_pad = embeddings
    if Bp != B or Dp != D:
        e_pad = jnp.pad(embeddings, ((0, Bp - B), (0, Dp - D)))

    # Per-row stats, computed once.  F.pairwise_distance adds eps to every element of
    # (a - b):  ||a-b+eps||^2 = ||a||^2 + ||b||^2 - 2<a,b> + 2*eps*(sum a - sum b) + D*eps^2.
    e32 = embeddings.astype(jnp.float32)
    sq = jnp.sum(e32 * e32, axis=1)
    sm = jnp.sum(e32, axis=1)
    half = jnp.float32(0.5 * D * eps * eps)
    rterm = sq + jnp.float32(2.0 * eps) * sm + half       # row-side term
    cterm = sq - jnp.float32(2.0 * eps) * sm + half       # col-side term
    lab = jnp.asarray(labels).astype(jnp.int32)
    if Bp != B:
        rterm = jnp.pad(rterm, (0, Bp - B))
        cterm = jnp.pad(cterm, (0, Bp - B))
        lab = jnp.pad(lab, (0, Bp - B), constant_values=-1)
    rterm = rterm.reshape(Bp, 1)
    cterm = cterm.reshape(1, Bp)
    lab_rows = lab.reshape(Bp, 1)
    lab_cols = lab.reshape(1, Bp)

    kernel = functools.partial(_contrastive_tri_kernel, margin=float(margin),
                               batch=B, tile=tile)

    cost = pl.CostEstimate(
        flops=nsteps * (2 * tile * tile * Dp + 12 * tile * tile),
        transcendentals=nsteps * tile * tile,
        bytes_accessed=nsteps * (2 * tile * Dp * itemsize + 4 * tile * 4 + 8 * tile * 4)
                       + 2 * Bp * 4,
    )

    vmem_limit = int(min(56 * 1024 * 1024,
                         max(32 * 1024 * 1024,
                             4 * tile * Dp * itemsize + 16 * tile * tile * 4)))

    out = pl.pallas_call(
        kernel,
        out_shape=jax.ShapeDtypeStruct((8 * nsteps, tile), jnp.float32),
        grid_spec=pltpu.PrefetchScalarGridSpec(
            num_scalar_prefetch=2,                       # (bi, bj) block index tables
            grid=(nsteps,),
            in_specs=[
                pl.BlockSpec((tile, Dp), lambda s, bi, bj: (bi[s], 0)),   # row panel of E
                pl.BlockSpec((tile, Dp), lambda s, bi, bj: (bj[s], 0)),   # col panel of E
                pl.BlockSpec((tile, 1), lambda s, bi, bj: (bi[s], 0)),    # row terms
                pl.BlockSpec((1, tile), lambda s, bi, bj: (0, bj[s])),    # col terms
                pl.BlockSpec((tile, 1), lambda s, bi, bj: (bi[s], 0)),    # row labels
                pl.BlockSpec((1, tile), lambda s, bi, bj: (0, bj[s])),    # col labels
            ],
            # Each step owns its own lane-dense (8, tile) output block -> no shared
            # accumulator, grid axis can be "parallel" (v7x megacore; no-op on v5e/v6e).
            out_specs=pl.BlockSpec((8, tile), lambda s, bi, bj: (s, 0)),
        ),
        compiler_params=pltpu.CompilerParams(
            dimension_semantics=("parallel",),
            vmem_limit_bytes=vmem_limit,
        ),
        cost_estimate=cost,
    )(bi_tab, bj_tab, e_pad, e_pad, rterm, cterm, lab_rows, lab_cols)

    return jnp.sum(out)


def contrastive_loss_forward(embeddings, labels, margin, **kw):
    # Projector = Identity (BaseContrastiveLoss default), so project(x) == x.
    # TODO(synk): only the "all pairs" selector (same label -> positive, different label
    # -> negative, over i < j) is reproduced in-kernel; arbitrary user-supplied
    # pair_selector objects (e.g. hard-negative mining) are not translated.
    return contrastive_loss_pallas(embeddings, labels, margin, **kw)


def _reference_loss(embeddings, labels, margin, eps=_EPS):
    """NumPy reference matching the PyTorch forward (vectorized pair selection)."""
    e = np.asarray(embeddings, dtype=np.float64)
    labels = np.asarray(labels)
    iu, ju = np.triu_indices(labels.shape[0], k=1)
    same = labels[iu] == labels[ju]
    dpos = e[iu[same]] - e[ju[same]] + eps
    pos_loss = np.sum(np.sum(dpos * dpos, axis=-1))
    dneg = e[iu[~same]] - e[ju[~same]] + eps
    dist = np.sqrt(np.sum(dneg * dneg, axis=-1))
    neg_loss = np.sum(np.maximum(margin - dist, 0.0) ** 2)
    return pos_loss + neg_loss


if __name__ == "__main__":
    key = jax.random.PRNGKey(0)
    margin = 10.0   # large enough that the hinge (negative) branch is exercised

    # Small case (single grid step after padding to 128).
    B, D = 8, 32
    k1, k2 = jax.random.split(key)
    emb_small = jax.random.normal(k1, (B, D), dtype=jnp.float32)
    lab_small = jnp.array([0, 0, 1, 1, 0, 1, 0, 1], dtype=jnp.int32)
    loss_small = jax.block_until_ready(contrastive_loss_forward(emb_small, lab_small, margin))
    ref_small = _reference_loss(np.asarray(emb_small), np.asarray(lab_small), margin)
    assert np.allclose(np.asarray(loss_small), ref_small, rtol=1e-4, atol=1e-2), \
        (float(loss_small), float(ref_small))

    # Larger, non-aligned case (padding + masking, single 256 tile).
    B2, D2 = 200, 72
    emb_big = jax.random.normal(k2, (B2, D2), dtype=jnp.float32)
    lab_big = jnp.arange(B2, dtype=jnp.int32) % 3
    loss_big = jax.block_until_ready(contrastive_loss_forward(emb_big, lab_big, margin))
    ref_big = _reference_loss(np.asarray(emb_big), np.asarray(lab_big), margin)
    assert np.allclose(np.asarray(loss_big), ref_big, rtol=1e-3, atol=1e-1), \
        (float(loss_big), float(ref_big))

    # Same data with a forced 128 tile -> 2x2 block triangle (3 grid steps): exercises
    # the scalar-prefetched (bi, bj) tables, diagonal masking and per-step outputs.
    loss_multi = jax.block_until_ready(
        contrastive_loss_forward(emb_big, lab_big, margin, block=128))
    assert np.allclose(np.asarray(loss_multi), ref_big, rtol=1e-3, atol=1e-1), \
        (float(loss_multi), float(ref_big))

    print("KERNEL_OK")
</pallas_src>

<mosaic_0001>
module attributes {stable_mosaic.version = 11 : i64} {
  func.func @_contrastive_tri_kernel(%arg0: i32, %arg1: memref<1xi32, #tpu.memory_space<smem>>, %arg2: memref<1xi32, #tpu.memory_space<smem>>, %arg3: memref<128x128xf32, #tpu.memory_space<vmem>>, %arg4: memref<128x128xf32, #tpu.memory_space<vmem>>, %arg5: memref<128x1xf32, #tpu.memory_space<vmem>>, %arg6: memref<1x128xf32, #tpu.memory_space<vmem>>, %arg7: memref<128x1xi32, #tpu.memory_space<vmem>>, %arg8: memref<1x128xi32, #tpu.memory_space<vmem>>, %arg9: memref<8x128xf32, #tpu.memory_space<vmem>>) attributes {dimension_semantics = [#tpu.dimension_semantics<parallel>], iteration_bounds = array<i64: 1>, scalar_prefetch = 2 : i64, scratch_operands = 0 : i64, tpu.core_type = #tpu.core_type<tc>, window_params = [{transform_indices = @transform_0, window_bounds = array<i64: 128, 128>}, {transform_indices = @transform_1, window_bounds = array<i64: 128, 128>}, {transform_indices = @transform_2, window_bounds = array<i64: 128, 1>}, {transform_indices = @transform_3, window_bounds = array<i64: 1, 128>}, {transform_indices = @transform_4, window_bounds = array<i64: 128, 1>}, {transform_indices = @transform_5, window_bounds = array<i64: 1, 128>}, {transform_indices = @transform_6, window_bounds = array<i64: 8, 128>}]} {
    %0 = arith.index_cast %arg0 : i32 to index
    %1 = memref.load %arg1[%0] : memref<1xi32, #tpu.memory_space<smem>>
    %2 = arith.index_cast %arg0 : i32 to index
    %3 = memref.load %arg2[%2] : memref<1xi32, #tpu.memory_space<smem>>
    %c0 = arith.constant 0 : index
    %c0_0 = arith.constant 0 : index
    %4 = vector.load %arg3[%c0, %c0_0] : memref<128x128xf32, #tpu.memory_space<vmem>>, vector<128x128xf32>
    %c0_1 = arith.constant 0 : index
    %c0_2 = arith.constant 0 : index
    %5 = vector.load %arg4[%c0_1, %c0_2] : memref<128x128xf32, #tpu.memory_space<vmem>>, vector<128x128xf32>
    %cst = arith.constant dense<0.000000e+00> : vector<128x128xf32>
    %6 = tpu.matmul %4, %5, %cst {dimension_numbers = #tpu.dot_dimension_numbers<[1], [1], [0], [0], [0, 0, 1, 0], [], []>} : vector<128x128xf32>, vector<128x128xf32>, vector<128x128xf32> -> vector<128x128xf32>
    %c0_3 = arith.constant 0 : index
    %c0_4 = arith.constant 0 : index
    %7 = vector.load %arg5[%c0_3, %c0_4] : memref<128x1xf32, #tpu.memory_space<vmem>>, vector<128x1xf32>
    %c0_5 = arith.constant 0 : index
    %c0_6 = arith.constant 0 : index
    %8 = vector.load %arg6[%c0_5, %c0_6] : memref<1x128xf32, #tpu.memory_space<vmem>>, vector<1x128xf32>
    %9 = vector.broadcast %7 : vector<128x1xf32> to vector<128x128xf32>
    %10 = vector.broadcast %8 : vector<1x128xf32> to vector<128x128xf32>
    %11 = arith.addf %9, %10 : vector<128x128xf32>
    %cst_7 = arith.constant 2.000000e+00 : f32
    %12 = vector.broadcast %cst_7 : f32 to vector<128x128xf32>
    %13 = arith.mulf %12, %6 : vector<128x128xf32>
    %14 = arith.subf %11, %13 : vector<128x128xf32>
    %cst_8 = arith.constant 0.000000e+00 : f32
    %15 = vector.broadcast %cst_8 : f32 to vector<128x128xf32>
    %16 = arith.maximumf %14, %15 : vector<128x128xf32>
    %c128_i32 = arith.constant 128 : i32
    %17 = arith.muli %1, %c128_i32 : i32
    %18 = tpu.iota {dimensions = array<i32: 0>} : vector<128x1xi32>
    %19 = vector.broadcast %17 : i32 to vector<128x1xi32>
    %20 = arith.addi %19, %18 : vector<128x1xi32>
    %c128_i32_9 = arith.constant 128 : i32
    %21 = arith.muli %3, %c128_i32_9 : i32
    %22 = tpu.iota {dimensions = array<i32: 1>} : vector<1x128xi32>
    %23 = vector.broadcast %21 : i32 to vector<1x128xi32>
    %24 = arith.addi %23, %22 : vector<1x128xi32>
    %25 = vector.broadcast %24 : vector<1x128xi32> to vector<128x128xi32>
    %26 = vector.broadcast %20 : vector<128x1xi32> to vector<128x128xi32>
    %27 = arith.cmpi sgt, %25, %26 : vector<128x128xi32>
    %c8_i32 = arith.constant 8 : i32
    %28 = vector.broadcast %c8_i32 : i32 to vector<128x1xi32>
    %29 = arith.cmpi slt, %20, %28 : vector<128x1xi32>
    %30 = vector.broadcast %29 : vector<128x1xi1> to vector<128x128xi1>
    %31 = arith.andi %27, %30 : vector<128x128xi1>
    %c8_i32_10 = arith.constant 8 : i32
    %32 = vector.broadcast %c8_i32_10 : i32 to vector<1x128xi32>
    %33 = arith.cmpi slt, %24, %32 : vector<1x128xi32>
    %34 = vector.broadcast %33 : vector<1x128xi1> to vector<128x128xi1>
    %35 = arith.andi %31, %34 : vector<128x128xi1>
    %c0_11 = arith.constant 0 : index
    %c0_12 = arith.constant 0 : index
    %36 = vector.load %arg7[%c0_11, %c0_12] : memref<128x1xi32, #tpu.memory_space<vmem>>, vector<128x1xi32>
    %c0_13 = arith.constant 0 : index
    %c0_14 = arith.constant 0 : index
    %37 = vector.load %arg8[%c0_13, %c0_14] : memref<1x128xi32, #tpu.memory_space<vmem>>, vector<1x128xi32>
    %38 = vector.broadcast %36 : vector<128x1xi32> to vector<128x128xi32>
    %39 = vector.broadcast %37 : vector<1x128xi32> to vector<128x128xi32>
    %40 = arith.cmpi eq, %38, %39 : vector<128x128xi32>
    %41 = math.sqrt %16 : vector<128x128xf32>
    %cst_15 = arith.constant 1.000000e+01 : f32
    %42 = vector.broadcast %cst_15 : f32 to vector<128x128xf32>
    %43 = arith.subf %42, %41 : vector<128x128xf32>
    %cst_16 = arith.constant 0.000000e+00 : f32
    %44 = vector.broadcast %cst_16 : f32 to vector<128x128xf32>
    %45 = arith.maximumf %43, %44 : vector<128x128xf32>
    %46 = arith.mulf %45, %45 : vector<128x128xf32>
    %47 = arith.select %40, %16, %46 : vector<128x128xi1>, vector<128x128xf32>
    %cst_17 = arith.constant 0.000000e+00 : f32
    %48 = vector.broadcast %cst_17 : f32 to vector<128x128xf32>
    %49 = arith.select %35, %47, %48 : vector<128x128xi1>, vector<128x128xf32>
    %50 = vector.shape_cast %49 : vector<128x128xf32> to vector<16x8x128xf32>
    %cst_18 = arith.constant dense<0.000000e+00> : vector<8x128xf32>
    %51 = vector.multi_reduction <add>, %50, %cst_18 [0] : vector<16x8x128xf32> to vector<8x128xf32>
    %c0_19 = arith.constant 0 : index
    %c0_20 = arith.constant 0 : index
    %52 = vector.load %arg9[%c0_19, %c0_20] : memref<8x128xf32, #tpu.memory_space<vmem>>, vector<8x128xf32>
    tpu.vector_store %arg9[%c0_19, %c0_20], %51 {strides = array<i32>} : memref<8x128xf32, #tpu.memory_space<vmem>>, vector<8x128xf32>,
    return
  }
  func.func @transform_0(%arg0: i32, %arg1: memref<1xi32, #tpu.memory_space<smem>>, %arg2: memref<1xi32, #tpu.memory_space<smem>>) -> (i32, i32) {
    %0 = arith.index_cast %arg0 : i32 to index
    %1 = memref.load %arg1[%0] : memref<1xi32, #tpu.memory_space<smem>>
    %c0_i32 = arith.constant 0 : i32
    %c0_i32_0 = arith.constant 0 : i32
    return %1, %c0_i32 : i32, i32
  }
  func.func @transform_1(%arg0: i32, %arg1: memref<1xi32, #tpu.memory_space<smem>>, %arg2: memref<1xi32, #tpu.memory_space<smem>>) -> (i32, i32) {
    %0 = arith.index_cast %arg0 : i32 to index
    %1 = memref.load %arg2[%0] : memref<1xi32, #tpu.memory_space<smem>>
    %c0_i32 = arith.constant 0 : i32
    %c0_i32_0 = arith.constant 0 : i32
    return %1, %c0_i32 : i32, i32
  }
  func.func @transform_2(%arg0: i32, %arg1: memref<1xi32, #tpu.memory_space<smem>>, %arg2: memref<1xi32, #tpu.memory_space<smem>>) -> (i32, i32) {
    %0 = arith.index_cast %arg0 : i32 to index
    %1 = memref.load %arg1[%0] : memref<1xi32, #tpu.memory_space<smem>>
    %c0_i32 = arith.constant 0 : i32
    %c0_i32_0 = arith.constant 0 : i32
    return %1, %c0_i32 : i32, i32
  }
  func.func @transform_3(%arg0: i32, %arg1: memref<1xi32, #tpu.memory_space<smem>>, %arg2: memref<1xi32, #tpu.memory_space<smem>>) -> (i32, i32) {
    %0 = arith.index_cast %arg0 : i32 to index
    %1 = memref.load %arg2[%0] : memref<1xi32, #tpu.memory_space<smem>>
    %c0_i32 = arith.constant 0 : i32
    %c0_i32_0 = arith.constant 0 : i32
    return %c0_i32, %1 : i32, i32
  }
  func.func @transform_4(%arg0: i32, %arg1: memref<1xi32, #tpu.memory_space<smem>>, %arg2: memref<1xi32, #tpu.memory_space<smem>>) -> (i32, i32) {
    %0 = arith.index_cast %arg0 : i32 to index
    %1 = memref.load %arg1[%0] : memref<1xi32, #tpu.memory_space<smem>>
    %c0_i32 = arith.constant 0 : i32
    %c0_i32_0 = arith.constant 0 : i32
    return %1, %c0_i32 : i32, i32
  }
  func.func @transform_5(%arg0: i32, %arg1: memref<1xi32, #tpu.memory_space<smem>>, %arg2: memref<1xi32, #tpu.memory_space<smem>>) -> (i32, i32) {
    %0 = arith.index_cast %arg0 : i32 to index
    %1 = memref.load %arg2[%0] : memref<1xi32, #tpu.memory_space<smem>>
    %c0_i32 = arith.constant 0 : i32
    %c0_i32_0 = arith.constant 0 : i32
    return %c0_i32, %1 : i32, i32
  }
  func.func @transform_6(%arg0: i32, %arg1: memref<1xi32, #tpu.memory_space<smem>>, %arg2: memref<1xi32, #tpu.memory_space<smem>>) -> (i32, i32) {
    %c0_i32 = arith.constant 0 : i32
    %c0_i32_0 = arith.constant 0 : i32
    return %arg0, %c0_i32 : i32, i32
  }
}

</mosaic_0001>

<bundles_post_ra>
// kernel: tpu_custom_call.1
= control target key start
LH: loop header
LB: loop body
LE: loop exit
PB: predicated region body
PF: predicated region fallthrough
CT: control target
= control target key end

     0   :  { %s2059_s0 = inlined_call_operand.<no memory space> [shape: s32[1], index: 0, kind: input, shape index: {}]   ;;  %s2060_s1 = inlined_call_operand.<no memory space> [shape: s32[1], index: 1, kind: input, shape index: {}]   ;;  %s2061_s2 = inlined_call_operand.vmem [shape: f32[128,128], index: 2, kind: input, shape index: {}]   ;;  %s2062_s3 = inlined_call_operand.vmem [shape: f32[128,128], index: 3, kind: input, shape index: {}]   ;;  %s2063_s4 = inlined_call_operand.vmem [shape: f32[128,1], index: 4, kind: input, shape index: {}]   ;;  %s2064_s5 = inlined_call_operand.vmem [shape: f32[1,128], index: 5, kind: input, shape index: {}]   ;;  %s2065_s6 = inlined_call_operand.vmem [shape: s32[128,1], index: 6, kind: input, shape index: {}]   ;;  %s2066_s7 = inlined_call_operand.vmem [shape: s32[1,128], index: 7, kind: input, shape index: {}]   ;;  %s2067_s8 = inlined_call_operand.hbm [shape: f32[8,128], index: 8, kind: output, shape index: {}]  }
   0x1   :  { %s968_s29 = sshll.u32 %s2060_s1, 4  ;;  %s966_s10 = sshll.u32 %s2059_s0, 4 }
   0x2   :  { %15 = vsyncpa [#allocation6], 0  ;;  %p112_p0 = scmp.lt.s32.totalorder %s968_s29, 15  ;;  %p104_p1 = scmp.lt.s32.totalorder %s966_s10, 15  ;;  %v1174_v0 = vmov 0  }
   0x3   :  { %1116 = vset.pattern.permute.xlu0 %v1174_v0  ;;  %1117 = vset.pattern.permute.xlu1 %v1174_v0  ;;  %p127_p2 = scmp.lt.s32.totalorder %s2060_s1, 0 }
   0x4   :  { %s2136_s29 = smov (!%p112_p0, %s968_s29), 15  ;;  %s2138_s10 = smov (!%p104_p1, %s966_s10), 15 }
   0x5   :  { %s969_s11 = sshll.u32 %s2136_s29, 3  ;;  %s1232_s15 = sshll.u32 %s2138_s10, 3 }
   0x6   :  { %s1230_s14 = scalar_lea.vmem %s2062_s3, %s969_s11  ;;  %s1242_s3 = scalar_lea.vmem %s2061_s2, %s1232_s15 }
   0x7   :  { %v162_v1 = vld [vmem:[%s1230_s14] sm:$0xff]  ;;  %v163_v2 = vld [vmem:[%s1230_s14 + $0x8] sm:$0xff]  ;;  %v164_v3 = vld [vmem:[%s1230_s14 + $0x10] sm:$0xff]  ;;  %s1252_s2 = scalar_lea.vmem %s2063_s4, %s1232_s15  ;;  %s1279_s21 = scalar_lea.vmem %s2065_s6, %s1232_s15 }
   0x8   :  { %v1066_v4 = vpack.c.bf16 %v163_v2, %v162_v1  ;;  %v165_v5 = vld [vmem:[%s1230_s14 + $0x18] sm:$0xff]  ;;  %v146_v7 = vld [vmem:[%s1242_s3] sm:$0xff]  ;;  %v167_v10 = vld [vmem:[%s1230_s14 + $0x28] sm:$0xff]  ;;  %s1322_s25 = scalar_select %p127_p2, %s2060_s1, 0 }
   0x9   :  { %v1070_v6 = vpack.c.bf16 %v165_v5, %v164_v3  ;;  %v154_v8 = vld [vmem:[%s1242_s3 + $0x40] sm:$0xff]  ;;  %1042 = vmatprep.mubr.f32.mxu0 %v146_v7  ;;  %v325_v13 = vld [vmem:[%s1252_s2 + $0x10] sm:$0xff]  ;;  %v324_v14 = vld [vmem:[%s1252_s2 + $0x8] sm:$0xff]  ;;  %s976_s11 = sshll.u32 %s2060_s1, 7 }
   0xa   :  { %1067 = vmatprep.subr.bf16.mxu0 %v1066_v4  ;;  %1098 = vmatprep.subr.bf16.mxu1 %v1066_v4  ;;  %v166_v9 = vld [vmem:[%s1230_s14 + $0x20] sm:$0xff]  ;;  %v168_v15 = vld [vmem:[%s1230_s14 + $0x30] sm:$0xff]  ;;  %v169_v16 = vld [vmem:[%s1230_s14 + $0x38] sm:$0xff]  ;;  %s129_s28 = scalar_lea.vmem %s2064_s5, %s1322_s25  ;;  %s975_s5 = sshll.u32 %s2059_s0, 7 }
   0xb   :  { %1069 = vmatpush3.bf16.xpose.msra.mxu0 %v1066_v4  ;;  %1106 = vmatpush3.bf16.xpose.msra.mxu1 %v1066_v4  ;;  %v1074_v11 = vpack.c.bf16 %v167_v10, %v166_v9  ;;  %v323_v12 = vld [vmem:[%s1252_s2] sm:$0xff]  ;;  %v326_v17 = vld [vmem:[%s1252_s2 + $0x18] sm:$0xff]  ;;  %v1078_v19 = vpack.c.bf16 %v169_v16, %v168_v15  ;;  %v328_v20 = vld [vmem:[%s1252_s2 + $0x28] sm:$0xff]  ;;  %s142_s12 = scalar_lea.vmem %s2066_s7, %s1322_s25  ;;  %s1175_s7 = smov [#allocation5]  }
   0xc   :  { %1071 = vmatprep.subr.bf16.mxu0 %v1070_v6  ;;  %1099 = vmatprep.subr.bf16.mxu1 %v1070_v6  ;;  %v327_v18 = vld [vmem:[%s1252_s2 + $0x20] sm:$0xff]  ;;  %v329_v21 = vld [vmem:[%s1252_s2 + $0x30] sm:$0xff]  ;;  %v171_v23 = vld [vmem:[%s1230_s14 + $0x48] sm:$0xff]  ;;  %s928_s13 = sshll.u32 %s1175_s7, 4  ;;  %s929_s13 = int_to_ptr.vmem [resolvable:$true] %s928_s13 }
   0xd   :  { %1054 = vmatprep.mubr.f32.mxu1 %v154_v8  ;;  %342 = vperm.xlu0 %1116, %v323_v12   ;;  %v170_v22 = vld [vmem:[%s1230_s14 + $0x40] sm:$0xff]  ;;  %v330_v24 = vld [vmem:[%s1252_s2 + $0x38] sm:$0xff]  ;;  %v332_v27 = vld [vmem:[%s1252_s2 + $0x48] sm:$0xff]  ;;  %p1155_p4 = scmp.lt.s32.totalorder %s929_s13, %s929_s13 }
   0xe   :  { %352 = vperm.xlu1 %1117, %v325_v13   ;;  %v331_v25 = vld [vmem:[%s1252_s2 + $0x40] sm:$0xff]  ;;  %v1082_v26 = vpack.c.bf16 %v171_v23, %v170_v22  ;;  %v333_v28 = vld [vmem:[%s1252_s2 + $0x50] sm:$0xff]  ;;  %v173_v30 = vld [vmem:[%s1230_s14 + $0x58] sm:$0xff] }
   0xf   :  { %v172_v29 = vld [vmem:[%s1230_s14 + $0x50] sm:$0xff]  ;;  %v334_v31 = vld [vmem:[%s1252_s2 + $0x58] sm:$0xff]  ;;  %v335_v32 = vld [vmem:[%s1252_s2 + $0x60] sm:$0xff] }
  0x10   :  { %v1086_v33 = vpack.c.bf16 %v173_v30, %v172_v29  ;;  %v336_v34 = vld [vmem:[%s1252_s2 + $0x68] sm:$0xff]  ;;  %v337_v35 = vld [vmem:[%s1252_s2 + $0x70] sm:$0xff]  ;;  %v174_v36 = vld [vmem:[%s1230_s14 + $0x60] sm:$0xff] }
  0x11   :  { %347 = vperm.xlu0 %1116, %v324_v14   ;;  %v175_v37 = vld [vmem:[%s1230_s14 + $0x68] sm:$0xff]  ;;  %v629_v38 = vld [vmem:[%s1279_s21] sm:$0xff]  ;;  %v338_v41 = vld [vmem:[%s1252_s2 + $0x78] sm:$0xff] }
  0x12   :  { %357 = vperm.xlu1 %1117, %v326_v17   ;;  %v630_v39 = vld [vmem:[%s1279_s21 + $0x8] sm:$0xff]  ;;  %v1090_v40 = vpack.c.bf16 %v175_v37, %v174_v36  ;;  %v631_v42 = vld [vmem:[%s1279_s21 + $0x10] sm:$0xff]  ;;  %v177_v44 = vld [vmem:[%s1230_s14 + $0x78] sm:$0xff] }
  0x13   :  { %1073 = vmatpush3.bf16.xpose.msra.mxu0 %v1070_v6  ;;  %1107 = vmatpush3.bf16.xpose.msra.mxu1 %v1070_v6  ;;  %v176_v43 = vld [vmem:[%s1230_s14 + $0x70] sm:$0xff]  ;;  %v632_v45 = vld [vmem:[%s1279_s21 + $0x18] sm:$0xff]  ;;  %v633_v46 = vld [vmem:[%s1279_s21 + $0x20] sm:$0xff]  ;;  %s1150_s14 = scalar_lea.vmem %s929_s13, 128 }
  0x14   :  { %1075 = vmatprep.subr.bf16.mxu0 %v1074_v11  ;;  %1100 = vmatprep.subr.bf16.mxu1 %v1074_v11  ;;  %v1094_v47 = vpack.c.bf16 %v177_v44, %v176_v43  ;;  %v634_v48 = vld [vmem:[%s1279_s21 + $0x28] sm:$0xff]  ;;  %v635_v49 = vld [vmem:[%s1279_s21 + $0x30] sm:$0xff]  ;;  %v636_v50 = vld [vmem:[%s1279_s21 + $0x38] sm:$0xff]  ;;  %v1350_v43 = vstv %s975_s5  ;;  %p1151_p3 = scmp.ne.s32.totalorder %s929_s13, %s1150_s14  ;;  %p1156_p5 = scmp.lt.s32.totalorder %s1150_s14, %s1150_s14 }
  0x15   :  { %362 = vperm.xlu0 %1116, %v327_v18   ;;  %v637_v51 = vld [vmem:[%s1279_s21 + $0x40] sm:$0xff]  ;;  %v638_v52 = vld [vmem:[%s1279_s21 + $0x48] sm:$0xff]  ;;  %v639_v53 = vld [vmem:[%s1279_s21 + $0x50] sm:$0xff]  ;;  %v528_v44 = vstv %s976_s11 }
  0x16   :  { %367 = vperm.xlu1 %1117, %v328_v20   ;;  %v640_v54 = vld [vmem:[%s1279_s21 + $0x58] sm:$0xff]  ;;  %v147_v55 = vld [vmem:[%s1242_s3 + $0x8] sm:$0xff]  ;;  %v148_v57 = vld [vmem:[%s1242_s3 + $0x10] sm:$0xff]  ;;  %v491_v20 = vlaneseq  ;;  %p1157_p6 = por %p1156_p5, %p1155_p4 }
  0x17   :  { %v155_v56 = vld [vmem:[%s1242_s3 + $0x48] sm:$0xff]  ;;  %v156_v58 = vld [vmem:[%s1242_s3 + $0x50] sm:$0xff]  ;;  %v641_v59 = vld [vmem:[%s1279_s21 + $0x60] sm:$0xff] }
  0x18   :  { %v642_v60 = vld [vmem:[%s1279_s21 + $0x68] sm:$0xff]  ;;  %v149_v61 = vld [vmem:[%s1242_s3 + $0x18] sm:$0xff]  ;;  %v150_v63 = vld [vmem:[%s1242_s3 + $0x20] sm:$0xff]  ;;  %p1158_p7 = pnand %p1157_p6, %p1151_p3 }
  0x19   :  { %372 = vperm.xlu0 %1116, %v329_v21   ;;  %v157_v62 = vld [vmem:[%s1242_s3 + $0x58] sm:$0xff]  ;;  %v158_v0 = vld [vmem:[%s1242_s3 + $0x60] sm:$0xff]  ;;  %v643_v1 = vld [vmem:[%s1279_s21 + $0x70] sm:$0xff] }
  0x1a   :  { %377 = vperm.xlu1 %1117, %v330_v24   ;;  %v644_v2 = vld [vmem:[%s1279_s21 + $0x78] sm:$0xff]  ;;  %v151_v3 = vld [vmem:[%s1242_s3 + $0x28] sm:$0xff]  ;;  %v152_v5 = vld [vmem:[%s1242_s3 + $0x30] sm:$0xff] }
  0x1b   :  { %1077 = vmatpush3.bf16.xpose.msra.mxu0 %v1074_v11  ;;  %1108 = vmatpush3.bf16.xpose.msra.mxu1 %v1074_v11  ;;  %v159_v4 = vld [vmem:[%s1242_s3 + $0x68] sm:$0xff]  ;;  %v160_v6 = vld [vmem:[%s1242_s3 + $0x70] sm:$0xff]  ;;  %v153_v7 = vld [vmem:[%s1242_s3 + $0x38] sm:$0xff] }
  0x1c   :  { %1079 = vmatprep.subr.bf16.mxu0 %v1078_v19  ;;  %1101 = vmatprep.subr.bf16.mxu1 %v1078_v19  ;;  %v161_v8 = vld [vmem:[%s1242_s3 + $0x78] sm:$0xff]  ;;  %v1330_v23 = vld [vmem:[%s129_s28] ss:$0 sm:$0xff] }
  0x1d   :  { %382 = vperm.xlu0 %1116, %v331_v25   ;;  %v1332_v25 = vshrl.u32 %v491_v20, 7 }
  0x1e   :  { %387 = vperm.xlu1 %1117, %v332_v27  }
  0x1f   :  { %v493_v37 = vadd.s32 8, %v1332_v25 }
  0x21   :  { %392 = vperm.xlu0 %1116, %v333_v28  }
  0x22   :  { %397 = vperm.xlu1 %1117, %v334_v31  }
  0x23   :  { %1081 = vmatpush3.bf16.xpose.msra.mxu0 %v1078_v19  ;;  %1109 = vmatpush3.bf16.xpose.msra.mxu1 %v1078_v19 }
  0x24   :  { %1083 = vmatprep.subr.bf16.mxu0 %v1082_v26  ;;  %1102 = vmatprep.subr.bf16.mxu1 %v1082_v26 }
  0x25   :  { %402 = vperm.xlu0 %1116, %v335_v32  }
  0x26   :  { %407 = vperm.xlu1 %1117, %v336_v34  }
  0x29   :  { %412 = vperm.xlu0 %1116, %v337_v35  }
  0x2a   :  { %647 = vperm.xlu1 %1117, %v629_v38   ;;  %v527_v38 = vand.u32 127, %v491_v20 }
  0x2b   :  { %1085 = vmatpush3.bf16.xpose.msra.mxu0 %v1082_v26  ;;  %1110 = vmatpush3.bf16.xpose.msra.mxu1 %v1082_v26 }
  0x2c   :  { %1087 = vmatprep.subr.bf16.mxu0 %v1086_v33  ;;  %1103 = vmatprep.subr.bf16.mxu1 %v1086_v33 }
  0x2d   :  { %650 = vperm.xlu0 %1116, %v630_v39  }
  0x2e   :  { %417 = vperm.xlu1 %1117, %v338_v41  }
  0x31   :  { %653 = vperm.xlu0 %1116, %v631_v42  }
  0x32   :  { %656 = vperm.xlu1 %1117, %v632_v45  }
  0x33   :  { %1089 = vmatpush3.bf16.xpose.msra.mxu0 %v1086_v33  ;;  %1111 = vmatpush3.bf16.xpose.msra.mxu1 %v1086_v33 }
  0x34   :  { %1091 = vmatprep.subr.bf16.mxu0 %v1090_v40  ;;  %1104 = vmatprep.subr.bf16.mxu1 %v1090_v40 }
  0x35   :  { %659 = vperm.xlu0 %1116, %v633_v46  }
  0x36   :  { %662 = vperm.xlu1 %1117, %v634_v48  }
  0x39   :  { %665 = vperm.xlu0 %1116, %v635_v49  }
  0x3a   :  { %668 = vperm.xlu1 %1117, %v636_v50  }
  0x3b   :  { %1093 = vmatpush3.bf16.xpose.msra.mxu0 %v1090_v40  ;;  %1112 = vmatpush3.bf16.xpose.msra.mxu1 %v1090_v40 }
  0x3c   :  { %1095 = vmatprep.subr.bf16.mxu0 %v1094_v47  ;;  %1105 = vmatprep.subr.bf16.mxu1 %v1094_v47 }
  0x3d   :  { %671 = vperm.xlu0 %1116, %v637_v51  }
  0x3e   :  { %674 = vperm.xlu1 %1117, %v638_v52  }
  0x41   :  { %677 = vperm.xlu0 %1116, %v639_v53  }
  0x42   :  { %680 = vperm.xlu1 %1117, %v640_v54  }
  0x43   :  { %1097 = vmatpush3.bf16.xpose.msra.mxu0 %v1094_v47  ;;  %1113 = vmatpush3.bf16.xpose.msra.mxu1 %v1094_v47 }
  0x45   :  { %683 = vperm.xlu0 %1116, %v641_v59  }
  0x46   :  { %686 = vperm.xlu1 %1117, %v642_v60  }
  0x49   :  { %689 = vperm.xlu0 %1116, %v643_v1  }
  0x4a   :  { %1043 = vmatmul.mubr.f32.vlgmr.msra.gmra.mrb[0].mxu0 %v147_v55  ;;  %1055 = vmatmul.mubr.f32.vlgmr.msra.gmra.mrb[0].mxu1 %v155_v56 }
  0x4b   :  { %1045 = vmatprep.mubr.f32.mxu0 %v148_v57  ;;  %1057 = vmatprep.mubr.f32.mxu1 %v156_v58  ;;  %v1375_v57 = vadd.s32 %v1350_v43, %v493_v37  ;;  %v1377_v58 = vadd.s32 %v528_v44, %v527_v38  ;;  %v1459_v37 = vadd.s32 56, %v1332_v25  ;;  %v1462_v38 = vadd.s32 80, %v1332_v25 }
  0x4c   :  { %692 = vperm.xlu1 %1117, %v644_v2  }
  0x4d   :  { %vm531_vm0 = vcmp.gt.s32.totalorder %v1377_v58, %v1375_v57  ;;  %vm547_vm1 = vcmp.lt.s32.totalorder %v1375_v57, 8  ;;  %vm2068_vm4 = vcmp.lt.s32.totalorder %v1377_v58, 8 }
  0x4e   :  { %1046 = vmatmul.mubr.f32.gmra.mrb[2].mxu0 %v149_v61  ;;  %1058 = vmatmul.mubr.f32.gmra.mrb[2].mxu1 %v157_v62  ;;  %vm1493_vm11 = vmand %vm531_vm0, %vm547_vm1 }
  0x4f   :  { %1048 = vmatprep.mubr.f32.mxu0 %v150_v63  ;;  %1060 = vmatprep.mubr.f32.mxu1 %v158_v0  ;;  %vm1522_vm13 = vmand %vm1493_vm11, %vm2068_vm4 }
  0x52   :  { %1049 = vmatmul.mubr.f32.gmra.mrb[4].mxu0 %v151_v3  ;;  %1061 = vmatmul.mubr.f32.gmra.mrb[4].mxu1 %v159_v4  ;;  %v1392_v3 = vadd.s32 %v1350_v43, %v1332_v25 }
  0x53   :  { %1051 = vmatprep.mubr.f32.mxu0 %v152_v5  ;;  %1063 = vmatprep.mubr.f32.mxu1 %v160_v6  ;;  %v494_v5 = vadd.s32 16, %v1332_v25 }
  0x54   :  { %vm530_vm2 = vcmp.gt.s32.totalorder %v1377_v58, %v1392_v3  ;;  %vm546_vm3 = vcmp.lt.s32.totalorder %v1392_v3, 8 }
  0x55   :  { %vm1508_vm12 = vmand %vm530_vm2, %vm546_vm3 }
  0x56   :  { %1052 = vmatmul.mubr.f32.gmra.mrb[6].mxu0 %v153_v7  ;;  %1064 = vmatmul.mubr.f32.gmra.mrb[6].mxu1 %v161_v8  ;;  %vm1540_vm14 = vmand %vm1508_vm12, %vm2068_vm4 }
  0x8c   :  { %v343_v10 = vpop.permute.xlu0 %342 }
  0x8d   :  { %v353_v9 = vpop.permute.xlu1 %352  ;;  %v426_v31 = vadd.f32 %v1330_v23, %v343_v10  ;;  %v500_v10 = vadd.s32 64, %v1332_v25 }
  0x8e   :  { %v428_v36 = vadd.f32 %v1330_v23, %v353_v9 }
  0x90   :  { %v348_v12 = vpop.permute.xlu0 %347 }
  0x91   :  { %v358_v11 = vpop.permute.xlu1 %357  ;;  %v427_v27 = vadd.f32 %v1330_v23, %v348_v12 }
  0x92   :  { %v429_v48 = vadd.f32 %v1330_v23, %v358_v11  ;;  %v501_v11 = vadd.s32 72, %v1332_v25 }
  0x94   :  { %v363_v14 = vpop.permute.xlu0 %362 }
  0x95   :  { %v368_v13 = vpop.permute.xlu1 %367  ;;  %v1356_v49 = vadd.f32 %v1330_v23, %v363_v14 }
  0x96   :  { %v1361_v52 = vadd.f32 %v1330_v23, %v368_v13 }
  0x98   :  { %v373_v16 = vpop.permute.xlu0 %372 }
  0x99   :  { %v378_v15 = vpop.permute.xlu1 %377  ;;  %v1364_v53 = vadd.f32 %v1330_v23, %v373_v16 }
  0x9a   :  { %v1367_v54 = vadd.f32 %v1330_v23, %v378_v15 }
  0x9c   :  { %v383_v18 = vpop.permute.xlu0 %382 }
  0x9d   :  { %v388_v17 = vpop.permute.xlu1 %387  ;;  %v1371_v55 = vadd.f32 %v1330_v23, %v383_v18 }
  0x9e   :  { %v435_v56 = vadd.f32 %v1330_v23, %v388_v17 }
  0xa0   :  { %v393_v21 = vpop.permute.xlu0 %392 }
  0xa1   :  { %v398_v19 = vpop.permute.xlu1 %397  ;;  %v1382_v61 = vadd.f32 %v1330_v23, %v393_v21 }
  0xa2   :  { %v1385_v62 = vadd.f32 %v1330_v23, %v398_v19 }
  0xa4   :  { %v403_v33 = vpop.permute.xlu0 %402 }
  0xa5   :  { %v1328_v22 = vpop.permute.xlu1 %407  ;;  %v1400_v12 = vadd.f32 %v1330_v23, %v403_v33 }
  0xa6   :  { %v1411_v16 = vadd.f32 %v1330_v23, %v1328_v22  ;;  %v1430_v22 = vadd.s32 %v1350_v43, %v494_v5 }
  0xa8   :  { %v413_v6 = vpop.permute.xlu0 %412  ;;  %vm532_vm3 = vcmp.gt.s32.totalorder %v1377_v58, %v1430_v22 }
  0xa9   :  { %v1342_v34 = vpop.permute.xlu1 %647  ;;  %v1414_v17 = vadd.f32 %v1330_v23, %v413_v6 }
  0xad   :  { %v418_v7 = vpop.permute.xlu1 %417 }
  0xae   :  { %v1421_v18 = vadd.f32 %v1330_v23, %v418_v7 }
 0x11d   :  { %v1044_v24 = vpop.f32.mrb[0].mxu0  ;;  %v1056_v26 = vpop.f32.mrb[0].mxu1 }
 0x11e   :  { %v443_v28 = vmul.f32 2.0, %v1044_v24  ;;  %v244_v29 = vpop.f32.mrb[1].mxu0  ;;  %v284_v30 = vpop.f32.mrb[1].mxu1  ;;  %v451_v2 = vmul.f32 2.0, %v1056_v26  ;;  %v1436_v26 = vadd.s32 %v1350_v43, %v500_v10 }
 0x11f   :  { %v442_v32 = vmul.f32 2.0, %v244_v29  ;;  %v450_v8 = vmul.f32 2.0, %v284_v30  ;;  %v1444_v30 = vadd.s32 24, %v1332_v25 }
 0x120   :  { %v459_v35 = vsub.f32 %v427_v27, %v443_v28  ;;  %v467_v21 = vsub.f32 %v435_v56, %v451_v2  ;;  %v1439_v27 = vadd.s32 %v1350_v43, %v501_v11  ;;  %v1441_v28 = vld [vmem:[%s142_s12] ss:$0 sm:$0xff] }
 0x121   :  { %v458_v39 = vsub.f32 %v426_v31, %v442_v32  ;;  %v1047_v40 = vpop.f32.mrb[2].mxu0  ;;  %v1346_v41 = vpop.f32.mrb[2].mxu1  ;;  %v466_v23 = vsub.f32 %v1371_v55, %v450_v8  ;;  %v1447_v31 = vadd.s32 32, %v1332_v25  ;;  %v1450_v32 = vadd.s32 88, %v1332_v25 }
 0x122   :  { %v1348_v42 = vmax.f32 %v459_v35, 0.0  ;;  %v445_v45 = vmul.f32 2.0, %v1047_v40  ;;  %v254_v46 = vpop.f32.mrb[3].mxu0  ;;  %v1352_v47 = vpop.f32.mrb[3].mxu1  ;;  %v1453_v35 = vadd.s32 40, %v1332_v25  ;;  %v1465_v44 = vmax.f32 %v467_v21, 0.0 }
 0x123   :  { %v1358_v50 = vmax.f32 %v458_v39, 0.0  ;;  %v444_v51 = vmul.f32 2.0, %v254_v46  ;;  %v651_v39 = vpop.permute.xlu0 %650  ;;  %v1469_v46 = vadd.s32 96, %v1332_v25  ;;  %v1475_v55 = vmax.f32 %v466_v23, 0.0 }
 0x124   :  { %1118 = vrsqrt.f32 %v1348_v42  ;;  %v461_v63 = vsub.f32 %v429_v48, %v445_v45  ;;  %vm699_vm5 = vcmp.eq.s32.totalorder %v651_v39, %v1441_v28  ;;  %vm723_vm6 = vcmp.eq.f32.partialorder %v1348_v42, inf }
 0x125   :  { %v1050_v59 = vpop.f32.mrb[4].mxu0  ;;  %v1379_v60 = vpop.f32.mrb[4].mxu1  ;;  %1120 = vrsqrt.f32 %v1358_v50  ;;  %v460_v4 = vsub.f32 %v428_v36, %v444_v51  ;;  %v1456_v36 = vadd.s32 48, %v1332_v25  ;;  %vm725_vm7 = vcmp.eq.f32.partialorder %v1348_v42, 0.0 }
 0x126   :  { %v264_v0 = vpop.f32.mrb[5].mxu0  ;;  %v1388_v1 = vpop.f32.mrb[5].mxu1  ;;  %v1395_v9 = vmax.f32 %v461_v63, 0.0  ;;  %v447_v29 = vmul.f32 2.0, %v1050_v59  ;;  %v726_v51 = vand.u32 2147483648, %v1348_v42  ;;  %vm698_vm8 = vcmp.eq.s32.totalorder %v1342_v34, %v1441_v28 }
 0x127   :  { %v1405_v13 = vmax.f32 %v460_v4, 0.0  ;;  %v446_v24 = vmul.f32 2.0, %v264_v0  ;;  %vm716_vm9 = vcmp.eq.f32.partialorder %v1358_v50, inf  ;;  %v719_v2 = vand.u32 2147483648, %v1358_v50 }
 0x128   :  { %1122 = vrsqrt.f32 %v1395_v9  ;;  %vm718_vm10 = vcmp.eq.f32.partialorder %v1358_v50, 0.0  ;;  %v453_v11 = vmul.f32 2.0, %v1346_v41  ;;  %v454_v41 = vmul.f32 2.0, %v1388_v1 }
 0x129   :  { %v1053_v14 = vpop.f32.mrb[6].mxu0  ;;  %v1407_v15 = vpop.f32.mrb[6].mxu1  ;;  %1124 = vrsqrt.f32 %v1405_v13  ;;  %v462_v45 = vsub.f32 %v1356_v49, %v446_v24  ;;  %v463_v49 = vsub.f32 %v1361_v52, %v447_v29  ;;  %vm737_vm15 = vcmp.eq.f32.partialorder %v1395_v9, inf }
 0x12a   :  { %v274_v19 = vpop.f32.mrb[7].mxu0  ;;  %v1424_v20 = vpop.f32.mrb[7].mxu1  ;;  %v449_v4 = vmul.f32 2.0, %v1053_v14  ;;  %1126 = vrsqrt.f32 %v1465_v44  ;;  %v452_v14 = vmul.f32 2.0, %v1352_v47  ;;  %v469_v1 = vsub.f32 %v1385_v62, %v453_v11 }
 0x12b   :  { %v448_v63 = vmul.f32 2.0, %v274_v19  ;;  %v1486_v7 = vmax.f32 %v462_v45, 0.0  ;;  %v1500_v24 = vmax.f32 %v463_v49, 0.0  ;;  %1128 = vrsqrt.f32 %v1475_v55 }
 0x12c   :  { %v465_v47 = vsub.f32 %v1367_v54, %v449_v4  ;;  %v455_v62 = vmul.f32 2.0, %v1379_v60  ;;  %vm730_vm0 = vcmp.eq.f32.partialorder %v1405_v13, inf  ;;  %vm739_vm1 = vcmp.eq.f32.partialorder %v1395_v9, 0.0 }
 0x12d   :  { %v464_v23 = vsub.f32 %v1364_v53, %v448_v63  ;;  %1130 = vrsqrt.f32 %v1486_v7  ;;  %v1568_v34 = vmax.f32 %v469_v1, 0.0  ;;  %vm732_vm2 = vcmp.eq.f32.partialorder %v1405_v13, 0.0 }
 0x12e   :  { %v1119_v33 = vpop.eup %1118  ;;  %1132 = vrsqrt.f32 %v1500_v24  ;;  %v471_v52 = vsub.f32 %v1411_v16, %v455_v62  ;;  %v1586_v16 = vadd.s32 120, %v1332_v25  ;;  %v1594_v57 = vadd.s32 %v1350_v43, %v1447_v31  ;;  %v657_v31 = vpop.permute.xlu1 %656 }
 0x12f   :  { %v722_v40 = vmul.f32 %v1119_v33, %v1348_v42  ;;  %v1121_v48 = vpop.eup %1120  ;;  %v1516_v33 = vadd.s32 104, %v1332_v25  ;;  %v1608_v53 = vadd.s32 %v1350_v43, %v1459_v37  ;;  %v1622_v37 = vadd.s32 %v1350_v43, %v1450_v32 }
 0x130   :  { %v715_v59 = vmul.f32 %v1121_v48, %v1358_v50  ;;  %v468_v48 = vsub.f32 %v1382_v61, %v452_v14  ;;  %v1626_v1 = vadd.s32 %v1350_v43, %v1469_v46  ;;  %vm744_vm11 = vcmp.eq.f32.partialorder %v1486_v7, inf }
 0x131   :  { %v724_v56 = vsel %vm723_vm6, %v1348_v42, %v722_v40  ;;  %vm701_vm6 = vcmp.eq.s32.totalorder %v657_v31, %v1441_v28  ;;  %v754_v62 = vand.u32 2147483648, %v1500_v24  ;;  %vm746_vm12 = vcmp.eq.f32.partialorder %v1486_v7, 0.0 }
 0x132   :  { %v727_v0 = vsel %vm725_vm7, %v726_v51, %v724_v56  ;;  %v717_v6 = vsel %vm716_vm9, %v1358_v50, %v715_v59  ;;  %v1123_v8 = vpop.eup %1122  ;;  %v1531_v51 = vmax.f32 %v464_v23, 0.0  ;;  %v1583_v23 = vadd.s32 112, %v1332_v25 }
 0x133   :  { %v827_v5 = vsub.f32 10.0, %v727_v0  ;;  %v720_v10 = vsel %vm718_vm10, %v719_v2, %v717_v6  ;;  %v1125_v29 = vpop.eup %1124  ;;  %v736_v45 = vmul.f32 %v1123_v8, %v1395_v9  ;;  %v1556_v0 = vmax.f32 %v465_v47, 0.0 }
 0x134   :  { %v826_v21 = vsub.f32 10.0, %v720_v10  ;;  %v729_v54 = vmul.f32 %v1125_v29, %v1405_v13  ;;  %1134 = vrsqrt.f32 %v1531_v51  ;;  %v740_v2 = vand.u32 2147483648, %v1395_v9  ;;  %v1127_v6 = vpop.eup %1126 }
 0x135   :  { %v843_v19 = vmax.f32 %v827_v5, 0.0  ;;  %v738_v63 = vsel %vm737_vm15, %v1395_v9, %v736_v45  ;;  %v1563_v5 = vmax.f32 %v468_v48, 0.0  ;;  %v456_v10 = vmul.f32 2.0, %v1424_v20  ;;  %v654_v45 = vpop.permute.xlu0 %653 }
 0x136   :  { %v842_v40 = vmax.f32 %v826_v21, 0.0  ;;  %v731_v4 = vsel %vm730_vm0, %v1405_v13, %v729_v54  ;;  %v741_v8 = vsel %vm739_vm1, %v740_v2, %v738_v63  ;;  %1136 = vrsqrt.f32 %v1556_v0  ;;  %v1129_v21 = vpop.eup %1128 }
 0x137   :  { %v859_v3 = vmul.f32 %v843_v19, %v843_v19  ;;  %v457_v19 = vmul.f32 2.0, %v1407_v15  ;;  %1138 = vrsqrt.f32 %v1563_v5  ;;  %v1590_v20 = vadd.s32 %v1350_v43, %v1444_v30  ;;  %v1131_v29 = vpop.eup %1130 }
 0x138   :  { %v858_v49 = vmul.f32 %v842_v40, %v842_v40  ;;  %v829_v15 = vsub.f32 10.0, %v741_v8  ;;  %v1602_v47 = vadd.s32 %v1350_v43, %v1456_v36  ;;  %1140 = vrsqrt.f32 %v1568_v34 }
 0x139   :  { %v875_v56 = vsel %vm699_vm5, %v1348_v42, %v859_v3  ;;  %v470_v42 = vsub.f32 %v1400_v12, %v454_v41  ;;  %vm548_vm5 = vcmp.lt.s32.totalorder %v1430_v22, 8  ;;  %v1598_v41 = vadd.s32 %v1350_v43, %v1453_v35  ;;  %v1133_v3 = vpop.eup %1132 }
 0x13a   :  { %v891_v61 = vsel %vm1522_vm13, %v875_v56, 0.0  ;;  %v874_v39 = vsel %vm698_vm8, %v1358_v50, %v858_v49  ;;  %v733_v50 = vand.u32 2147483648, %v1405_v13  ;;  %v472_v30 = vsub.f32 %v1414_v17, %v456_v10  ;;  %vm1662_vm15 = vmand %vm532_vm3, %vm548_vm5 }
 0x13b   :  { %v890_v60 = vsel %vm1540_vm14, %v874_v39, 0.0  ;;  %v1574_v14 = vmax.f32 %v470_v42, 0.0  ;;  %v1610_v40 = vmax.f32 %v471_v52, 0.0  ;;  %v473_v35 = vsub.f32 %v1421_v18, %v457_v19 }
 0x13c   :  { %v1565_v12 = vadd.f32 %v891_v61, %v890_v60  ;;  %v734_v11 = vsel %vm732_vm2, %v733_v50, %v731_v4  ;;  %v1616_v36 = vadd.s32 %v1350_v43, %v1462_v38  ;;  %v743_v17 = vmul.f32 %v1131_v29, %v1486_v7 }
 0x13d   :  { %v828_v25 = vsub.f32 10.0, %v734_v11  ;;  %1142 = vrsqrt.f32 %v1574_v14  ;;  %v1630_v18 = vadd.s32 %v1350_v43, %v1516_v33  ;;  %vm700_vm7 = vcmp.eq.s32.totalorder %v654_v45, %v1441_v28  ;;  %v1672_v11 = vpop.permute.xlu0 %659 }
 0x13e   :  { %v1135_v54 = vpop.eup %1134  ;;  %v778_v38 = vmul.f32 %v1127_v6, %v1465_v44  ;;  %vm772_vm8 = vcmp.eq.f32.partialorder %v1475_v55, inf  ;;  %v775_v48 = vand.u32 2147483648, %v1475_v55  ;;  %v845_v56 = vmax.f32 %v829_v15, 0.0 }
 0x13f   :  { %v844_v32 = vmax.f32 %v828_v25, 0.0  ;;  %v750_v59 = vmul.f32 %v1133_v3, %v1500_v24  ;;  %vm751_vm9 = vcmp.eq.f32.partialorder %v1500_v24, inf  ;;  %v1638_v46 = vmax.f32 %v472_v30, 0.0 }
 0x140   :  { %vm753_vm10 = vcmp.eq.f32.partialorder %v1500_v24, 0.0  ;;  %1144 = vrsqrt.f32 %v1610_v40  ;;  %v1643_v33 = vmax.f32 %v473_v35, 0.0  ;;  %v771_v49 = vmul.f32 %v1129_v21, %v1475_v55  ;;  %v1137_v39 = vpop.eup %1136 }
 0x141   :  { %v745_v61 = vsel %vm744_vm11, %v1486_v7, %v743_v17  ;;  %v757_v42 = vmul.f32 %v1135_v54, %v1531_v51  ;;  %v861_v63 = vmul.f32 %v845_v56, %v845_v56  ;;  %v747_v60 = vand.u32 2147483648, %v1486_v7  ;;  %v1139_v2 = vpop.eup %1138 }
 0x142   :  { %vm765_vm13 = vcmp.eq.f32.partialorder %v1556_v0, inf  ;;  %v860_v4 = vmul.f32 %v844_v32, %v844_v32  ;;  %v752_v50 = vsel %vm751_vm9, %v1500_v24, %v750_v59  ;;  %vm767_vm14 = vcmp.eq.f32.partialorder %v1556_v0, 0.0  ;;  %v1141_v10 = vpop.eup %1140  ;;  %v1716_v32 = vpop.permute.xlu1 %662 }
 0x143   :  { %1146 = vrsqrt.f32 %v1638_v46  ;;  %v748_v8 = vsel %vm746_vm12, %v747_v60, %v745_v61  ;;  %v768_v52 = vand.u32 2147483648, %v1556_v0  ;;  %vm758_vm0 = vcmp.eq.f32.partialorder %v1531_v51, inf  ;;  %v1735_v61 = vpop.permute.xlu0 %665 }
 0x144   :  { %1148 = vrsqrt.f32 %v1643_v33  ;;  %vm533_vm1 = vcmp.gt.s32.totalorder %v1377_v58, %v1590_v20  ;;  %vm549_vm2 = vcmp.lt.s32.totalorder %v1590_v20, 8  ;;  %v764_v22 = vmul.f32 %v1137_v39, %v1556_v0 }
 0x145   :  { %v759_v19 = vsel %vm758_vm0, %v1531_v51, %v757_v42  ;;  %vm760_vm3 = vcmp.eq.f32.partialorder %v1531_v51, 0.0  ;;  %vm534_vm5 = vcmp.gt.s32.totalorder %v1377_v58, %v1594_v57  ;;  %vm550_vm9 = vcmp.lt.s32.totalorder %v1594_v57, 8 }
 0x146   :  { %v773_v21 = vsel %vm772_vm8, %v1475_v55, %v771_v49  ;;  %v1686_v15 = vsel %vm701_vm6, %v1395_v9, %v861_v63  ;;  %v755_v25 = vsel %vm753_vm10, %v754_v62, %v752_v50  ;;  %v761_v30 = vand.u32 2147483648, %v1531_v51  ;;  %vm1699_vm8 = vmand %vm1662_vm15, %vm2068_vm4 }
 0x147   :  { %v1143_v29 = vpop.eup %1142  ;;  %vm535_vm11 = vcmp.gt.s32.totalorder %v1377_v58, %v1598_v41  ;;  %vm551_vm12 = vcmp.lt.s32.totalorder %v1598_v41, 8  ;;  %v785_v3 = vmul.f32 %v1139_v2, %v1563_v5  ;;  %v1706_v9 = vsel %vm700_vm7, %v1405_v13, %v860_v4 }
 0x148   :  { %v830_v35 = vsub.f32 10.0, %v748_v8  ;;  %vm774_vm6 = vcmp.eq.f32.partialorder %v1475_v55, 0.0  ;;  %vm779_vm10 = vcmp.eq.f32.partialorder %v1465_v44, inf  ;;  %v762_v17 = vsel %vm760_vm3, %v761_v30, %v759_v19 }
 0x149   :  { %v1712_v54 = vsel %vm774_vm6, %v775_v48, %v773_v21  ;;  %v780_v56 = vsel %vm779_vm10, %v1465_v44, %v778_v38  ;;  %vm781_vm15 = vcmp.eq.f32.partialorder %v1465_v44, 0.0  ;;  %v766_v13 = vsel %vm765_vm13, %v1556_v0, %v764_v22  ;;  %vm1772_vm10 = vmand %vm533_vm1, %vm549_vm2 }
 0x14a   :  { %vm786_vm4 = vcmp.eq.f32.partialorder %v1563_v5, inf  ;;  %v792_v45 = vmul.f32 %v1141_v10, %v1568_v34  ;;  %v799_v48 = vmul.f32 %v1143_v29, %v1574_v14  ;;  %v1145_v38 = vpop.eup %1144  ;;  %vm702_vm3 = vcmp.eq.s32.totalorder %v1672_v11, %v1441_v28  ;;  %v1762_v29 = vpop.permute.xlu1 %668 }
 0x14b   :  { %v892_v59 = vsel %vm1699_vm8, %v1706_v9, 0.0  ;;  %v782_v49 = vand.u32 2147483648, %v1465_v44  ;;  %v787_v62 = vsel %vm786_vm4, %v1563_v5, %v785_v3  ;;  %vm788_vm13 = vcmp.eq.f32.partialorder %v1563_v5, 0.0 }
 0x14c   :  { %v846_v42 = vmax.f32 %v830_v35, 0.0  ;;  %v789_v39 = vand.u32 2147483648, %v1563_v5  ;;  %v831_v63 = vsub.f32 10.0, %v755_v25  ;;  %v832_v60 = vsub.f32 10.0, %v762_v17 }
 0x14d   :  { %v769_v2 = vsel %vm767_vm14, %v768_v52, %v766_v13  ;;  %v1742_v4 = vsel %vm781_vm15, %v782_v49, %v780_v56  ;;  %vm793_vm6 = vcmp.eq.f32.partialorder %v1568_v34, inf  ;;  %vm800_vm4 = vcmp.eq.f32.partialorder %v1574_v14, inf  ;;  %v1147_v50 = vpop.eup %1146 }
 0x14e   :  { %vm553_vm7 = vcmp.lt.s32.totalorder %v1608_v53, 8  ;;  %v1749_v6 = vsel %vm788_vm13, %v789_v39, %v787_v62  ;;  %v794_v8 = vsel %vm793_vm6, %v1568_v34, %v792_v45  ;;  %v801_v52 = vsel %vm800_vm4, %v1574_v14, %v799_v48  ;;  %v1149_v22 = vpop.eup %1148  ;;  %vm1781_vm6 = vmand %vm534_vm5, %vm550_vm9  ;;  %v1791_v48 = vpop.permute.xlu0 %671 }
 0x14f   :  { %v806_v10 = vmul.f32 %v1145_v38, %v1610_v40  ;;  %vm703_vm14 = vcmp.eq.s32.totalorder %v1716_v32, %v1441_v28  ;;  %vm704_vm15 = vcmp.eq.s32.totalorder %v1735_v61, %v1441_v28  ;;  %vm795_vm0 = vcmp.eq.f32.partialorder %v1568_v34, 0.0  ;;  %vm1801_vm5 = vmand %vm535_vm11, %vm551_vm12 }
 0x150   :  { %v796_v19 = vand.u32 2147483648, %v1568_v34  ;;  %vm802_vm13 = vcmp.eq.f32.partialorder %v1574_v14, 0.0  ;;  %v803_v21 = vand.u32 2147483648, %v1574_v14  ;;  %v833_v30 = vsub.f32 10.0, %v769_v2 }
 0x151   :  { %v847_v3 = vmax.f32 %v831_v63, 0.0  ;;  %v848_v35 = vmax.f32 %v832_v60, 0.0  ;;  %v862_v17 = vmul.f32 %v846_v42, %v846_v42  ;;  %vm807_vm1 = vcmp.eq.f32.partialorder %v1610_v40, inf }
 0x152   :  { %v1785_v13 = vsel %vm795_vm0, %v796_v19, %v794_v8  ;;  %v1787_v20 = vsel %vm802_vm13, %v803_v21, %v801_v52  ;;  %v813_v45 = vmul.f32 %v1147_v50, %v1638_v46  ;;  %v808_v38 = vsel %vm807_vm1, %v1610_v40, %v806_v10  ;;  %v678_v9 = vpop.permute.xlu0 %677 }
 0x153   :  { %vm809_vm9 = vcmp.eq.f32.partialorder %v1610_v40, 0.0  ;;  %v820_v49 = vmul.f32 %v1149_v22, %v1643_v33  ;;  %v834_v62 = vsub.f32 10.0, %v1712_v54  ;;  %vm2087_vm13 = vcmp.lt.s32.totalorder %v1377_v58, 8 }
 0x154   :  { %vm1815_vm2 = vmand %vm1772_vm10, %vm2087_vm13  ;;  %v810_v42 = vand.u32 2147483648, %v1610_v40  ;;  %vm814_vm11 = vcmp.eq.f32.partialorder %v1638_v46, inf  ;;  %vm816_vm12 = vcmp.eq.f32.partialorder %v1638_v46, 0.0  ;;  %v835_v39 = vsub.f32 10.0, %v1742_v4 }
 0x155   :  { %vm2090_vm4 = vmmov %vm2087_vm13  ;;  %v849_v63 = vmax.f32 %v833_v30, 0.0  ;;  %v863_v60 = vmul.f32 %v847_v3, %v847_v3  ;;  %v864_v2 = vmul.f32 %v848_v35, %v848_v35  ;;  %v878_v50 = vsel %vm702_vm3, %v1486_v7, %v862_v17  ;;  %v675_v7 = vpop.permute.xlu1 %674 }
 0x156   :  { %vm1829_vm0 = vmand %vm1781_vm6, %vm2090_vm4  ;;  %vm706_vm10 = vcmp.eq.s32.totalorder %v1791_v48, %v1441_v28  ;;  %vm2093_vm13 = vcmp.lt.s32.totalorder %v1602_v47, 8  ;;  %vm2094_vm1 = vcmp.gt.s32.totalorder %v1377_v58, %v1602_v47  ;;  %v811_v8 = vsel %vm809_vm9, %v810_v42, %v808_v38 }
 0x157   :  { %vm1844_vm6 = vmand %vm2094_vm1, %vm2093_vm13  ;;  %v815_v52 = vsel %vm814_vm11, %v1638_v46, %v813_v45  ;;  %v817_v11 = vand.u32 2147483648, %v1638_v46  ;;  %vm821_vm3 = vcmp.eq.f32.partialorder %v1643_v33, inf  ;;  %v836_v22 = vsub.f32 10.0, %v1749_v6 }
 0x158   :  { %v822_v10 = vsel %vm821_vm3, %v1643_v33, %v820_v49  ;;  %v850_v19 = vmax.f32 %v834_v62, 0.0  ;;  %v907_v47 = vadd.f32 %v1565_v12, %v892_v59  ;;  %vm707_vm4 = vcmp.eq.s32.totalorder %v675_v7, %v1441_v28 }
 0x159   :  { %vm2097_vm9 = vcmp.lt.s32.totalorder %v1377_v58, 8  ;;  %v837_v25 = vsub.f32 10.0, %v1785_v13  ;;  %v851_v6 = vmax.f32 %v835_v39, 0.0  ;;  %v893_v31 = vsel %vm1815_vm2, %v1686_v15, 0.0  ;;  %v681_v38 = vpop.permute.xlu1 %680 }
 0x15a   :  { %vm1865_vm11 = vmand %vm1801_vm5, %vm2097_vm9  ;;  %v894_v12 = vsel %vm1829_vm0, %v878_v50, 0.0  ;;  %v865_v30 = vmul.f32 %v849_v63, %v849_v63  ;;  %v879_v3 = vsel %vm703_vm14, %v1500_v24, %v863_v60  ;;  %v880_v15 = vsel %vm704_vm15, %v1531_v51, %v864_v2 }
 0x15b   :  { %vm2100_vm8 = vmmov %vm2097_vm9  ;;  %v908_v35 = vadd.f32 %v907_v47, %v893_v31  ;;  %vm708_vm2 = vcmp.eq.s32.totalorder %v678_v9, %v1441_v28  ;;  %vm556_vm5 = vcmp.lt.s32.totalorder %v1616_v36, 8  ;;  %vm2103_vm0 = vcmp.gt.s32.totalorder %v1377_v58, %v1608_v53 }
 0x15c   :  { %vm1879_vm1 = vmand %vm1844_vm6, %vm2100_vm8  ;;  %v818_v32 = vsel %vm816_vm12, %v817_v11, %v815_v52  ;;  %vm823_vm14 = vcmp.eq.f32.partialorder %v1643_v33, 0.0  ;;  %v824_v24 = vand.u32 2147483648, %v1643_v33  ;;  %v838_v51 = vsub.f32 10.0, %v1787_v20 }
 0x15d   :  { %vm601_vm13 = vmand %vm2103_vm0, %vm553_vm7  ;;  %v852_v61 = vmax.f32 %v836_v22, 0.0  ;;  %v866_v17 = vmul.f32 %v850_v19, %v850_v19  ;;  %v909_v56 = vadd.f32 %v908_v35, %v894_v12  ;;  %vm2104_vm15 = vcmp.lt.s32.totalorder %v1436_v26, 8  ;;  %v687_v7 = vpop.permute.xlu1 %686 }
 0x15e   :  { %vm2105_vm6 = vcmp.gt.s32.totalorder %v1377_v58, %v1436_v26  ;;  %v825_v13 = vsel %vm823_vm14, %v824_v24, %v822_v10  ;;  %v839_v45 = vsub.f32 10.0, %v811_v8  ;;  %v895_v57 = vsel %vm1865_vm11, %v879_v3, 0.0  ;;  %vm2108_vm7 = vmmov %vm2100_vm8 }
 0x15f   :  { %vm1908_vm3 = vmand %vm2105_vm6, %vm2104_vm15  ;;  %v896_v20 = vsel %vm1879_vm1, %v880_v15, 0.0  ;;  %v853_v26 = vmax.f32 %v837_v25, 0.0  ;;  %v867_v62 = vmul.f32 %v851_v6, %v851_v6  ;;  %vm2111_vm9 = vcmp.eq.s32.totalorder %v1762_v29, %v1441_v28 }
 0x160   :  { %vm1918_vm12 = vmand %vm601_vm13, %vm2108_vm7  ;;  %v881_v41 = vsel %vm2111_vm9, %v1556_v0, %v865_v30  ;;  %v910_v42 = vadd.f32 %v909_v56, %v895_v57  ;;  %v523_v39 = vadd.s32 %v1350_v43, %v1583_v23  ;;  %vm541_vm11 = vcmp.gt.s32.totalorder %v1377_v58, %v1622_v37 }
 0x161   :  { %vm557_vm8 = vcmp.lt.s32.totalorder %v1622_v37, 8  ;;  %vm2112_vm1 = vcmp.lt.s32.totalorder %v1439_v27, 8  ;;  %vm2113_vm0 = vcmp.gt.s32.totalorder %v1377_v58, %v1439_v27  ;;  %v840_v54 = vsub.f32 10.0, %v818_v32  ;;  %vm2114_vm14 = vmmov %vm2108_vm7  ;;  %v693_v30 = vpop.permute.xlu1 %692 }
 0x162   :  { %vm603_vm13 = vmand %vm2113_vm0, %vm2112_vm1  ;;  %v854_v23 = vmax.f32 %v838_v51, 0.0  ;;  %v868_v29 = vmul.f32 %v852_v61, %v852_v61  ;;  %v882_v63 = vsel %vm706_vm10, %v1475_v55, %v866_v17  ;;  %v911_v60 = vadd.f32 %v910_v42, %v896_v20  ;;  %v684_v55 = vpop.permute.xlu0 %683 }
 0x163   :  { %vm1940_vm15 = vmand %vm1908_vm3, %vm2114_vm14  ;;  %vm542_vm6 = vcmp.gt.s32.totalorder %v1377_v58, %v1626_v1  ;;  %vm558_vm7 = vcmp.lt.s32.totalorder %v1626_v1, 8  ;;  %vm2117_vm3 = vcmp.gt.s32.totalorder %v1377_v58, %v1616_v36  ;;  %v841_v2 = vsub.f32 10.0, %v825_v13 }
 0x164   :  { %vm1956_vm9 = vmand %vm2117_vm3, %vm556_vm5  ;;  %v897_v48 = vsel %vm1918_vm12, %v881_v41, 0.0  ;;  %v855_v4 = vmax.f32 %v839_v45, 0.0  ;;  %v869_v8 = vmul.f32 %v853_v26, %v853_v26  ;;  %v883_v36 = vsel %vm707_vm4, %v1465_v44, %v867_v62 }
 0x165   :  { %vm2120_vm10 = vmmov %vm2114_vm14  ;;  %v912_v52 = vadd.f32 %v911_v60, %v897_v48  ;;  %v524_v11 = vadd.s32 %v1350_v43, %v1586_v16  ;;  %vm543_vm5 = vcmp.gt.s32.totalorder %v1377_v58, %v1630_v18  ;;  %vm559_vm12 = vcmp.lt.s32.totalorder %v1630_v18, 8 }
 0x166   :  { %vm1964_vm1 = vmand %vm603_vm13, %vm2120_vm10  ;;  %v898_v10 = vsel %vm1940_vm15, %v882_v63, 0.0  ;;  %v856_v44 = vmax.f32 %v840_v54, 0.0  ;;  %v870_v16 = vmul.f32 %v854_v23, %v854_v23  ;;  %v884_v22 = vsel %vm708_vm2, %v1563_v5, %v868_v29  ;;  %v690_v31 = vpop.permute.xlu0 %689 }
 0x167   :  { %vm605_vm0 = vmand %vm541_vm11, %vm557_vm8  ;;  %v913_v37 = vadd.f32 %v912_v52, %v898_v10  ;;  %vm709_vm11 = vcmp.eq.s32.totalorder %v681_v38, %v1441_v28  ;;  %vm544_vm8 = vcmp.gt.s32.totalorder %v1377_v58, %v523_v39  ;;  %vm560_vm14 = vcmp.lt.s32.totalorder %v523_v39, 8 }
 0x168   :  { %vm2123_vm4 = vmmov %vm2120_vm10  ;;  %v899_v19 = vsel %vm1964_vm1, %v883_v36, 0.0  ;;  %v857_v5 = vmax.f32 %v841_v2, 0.0  ;;  %v871_v21 = vmul.f32 %v855_v4, %v855_v4  ;;  %v885_v25 = vsel %vm709_vm11, %v1568_v34, %v869_v8 }
 0x169   :  { %vm1987_vm13 = vmand %vm1956_vm9, %vm2123_vm4  ;;  %v914_v6 = vadd.f32 %v913_v37, %v899_v19  ;;  %vm710_vm2 = vcmp.eq.s32.totalorder %v684_v55, %v1441_v28  ;;  %vm545_vm10 = vcmp.gt.s32.totalorder %v1377_v58, %v524_v11  ;;  %v872_v12 = vmul.f32 %v856_v44, %v856_v44 }
 0x16a   :  { %vm606_vm15 = vmand %vm542_vm6, %vm558_vm7  ;;  %v900_v1 = vsel %vm1987_vm13, %v884_v22, 0.0  ;;  %vm561_vm7 = vcmp.lt.s32.totalorder %v524_v11, 8  ;;  %v886_v9 = vsel %vm710_vm2, %v1574_v14, %v870_v16  ;;  %v873_v3 = vmul.f32 %v857_v5, %v857_v5 }
 0x16b   :  { %vm2126_vm3 = vmmov %vm2123_vm4  ;;  %v915_v59 = vadd.f32 %v914_v6, %v900_v1  ;;  %vm711_vm4 = vcmp.eq.s32.totalorder %v687_v7, %v1441_v28  ;;  %vm712_vm11 = vcmp.eq.s32.totalorder %v690_v31, %v1441_v28 }
 0x16c   :  { %vm2005_vm9 = vmand %vm605_vm0, %vm2126_vm3  ;;  %v887_v15 = vsel %vm711_vm4, %v1610_v40, %v871_v21  ;;  %v888_v32 = vsel %vm712_vm11, %v1638_v46, %v872_v12 }
 0x16d   :  { %vm607_vm6 = vmand %vm543_vm5, %vm559_vm12  ;;  %v901_v18 = vsel %vm2005_vm9, %v885_v25, 0.0 }
 0x16e   :  { %vm2129_vm1 = vmmov %vm2126_vm3  ;;  %v916_v35 = vadd.f32 %v915_v59, %v901_v18  ;;  %vm713_vm3 = vcmp.eq.s32.totalorder %v693_v30, %v1441_v28 }
 0x16f   :  { %vm2021_vm0 = vmand %vm606_vm15, %vm2129_vm1  ;;  %v889_v40 = vsel %vm713_vm3, %v1643_v33, %v873_v3 }
 0x170   :  { %vm608_vm5 = vmand %vm544_vm8, %vm560_vm14  ;;  %v902_v14 = vsel %vm2021_vm0, %v886_v9, 0.0 }
 0x171   :  { %vm2132_vm12 = vmmov %vm2129_vm1  ;;  %v917_v24 = vadd.f32 %v916_v35, %v902_v14 }
 0x172   :  { %vm626_vm13 = vmand %vm607_vm6, %vm2132_vm12 }
 0x173   :  { %vm609_vm15 = vmand %vm545_vm10, %vm561_vm7  ;;  %v903_v51 = vsel %vm626_vm13, %v887_v15, 0.0 }
 0x174   :  { %vm2133_vm8 = vmmov %vm2129_vm1  ;;  %v918_v61 = vadd.f32 %v917_v24, %v903_v51 }
 0x175   :  { %vm627_vm14 = vmand %vm608_vm5, %vm2133_vm8 }
 0x176   :  { %vm2134_vm9 = vmmov %vm2129_vm1  ;;  %v904_v17 = vsel %vm627_vm14, %v888_v32, 0.0 }
 0x177   :  { %vm628_vm2 = vmand %vm609_vm15, %vm2134_vm9  ;;  %v919_v56 = vadd.f32 %v918_v61, %v904_v17 }
 0x178   :  { %v905_v53 = vsel %vm628_vm2, %v889_v40, 0.0 }
 0x179   :  { %v920_v13 = vadd.f32 %v919_v56, %v905_v53 }
 0x17b   :  { %921 = vst [vmem:[#allocation5] sm:$0xff] %v920_v13 }
 0x17c   :  { %1161 = shalt.err (!%p1158_p7)
}
 0x17d   :  { %s1162_s17 = scalar_lea.hbm %s2067_s8, 128 }
 0x17e   :  { %p1163_p8 = scmp.ne.s32.totalorder %s2067_s8, %s1162_s17  ;;  %p1166_p9 = scmp.lt.u32.totalorder %s1162_s17, %s2067_s8 }
 0x180   :  { %p1168_p10 = pnand %p1166_p9, %p1163_p8 }
 0x182   :  { %1171 = shalt.err (!%p1168_p10)
}
 0x183   :  { %931 = dma.vmem_to_hbm [thread:$0]  %s929_s13, 128, %s2067_s8, [#allocation6]  }
 0x184   :  { %1172 = dma.done.wait [#allocation6], 128  }
 0x185   :  { %1173 = vsyncadd [#allocation6], 4294967168 }
 0x186   :  { %935 = vsyncpa [#allocation6], 1 }

</bundles_post_ra>
